<compile_context>
chip_gen: v7x
topology: tpu7x:2x2x1
jax: 0.10.0
libtpu: 0.0.40
codegen_flags: <defaults>
</compile_context>

<pallas_src>
import jax
import jax.numpy as jnp
from jax.experimental import pallas as pl
from jax.experimental.pallas import tpu as pltpu

# ---------------- config (small, consistent with BartConfig fields) ----------
SEQ = 8            # seq_len
BATCH = 2          # batch
EMBED = 32         # config.d_model
HEADS = 4          # config.encoder_attention_heads
HEAD_DIM = EMBED // HEADS
FFN = 64           # config.encoder_ffn_dim
LN_EPS = 1e-5
SCALING = HEAD_DIM ** (-0.5)

NEG_CROSS_BATCH = -1e30   # blocks attention across flattened batch elements
NEG_PADDED_KEY = -1e9     # key_padding_mask bias (finite: no -inf -> NaN hazard)

VEC_W = max(3 * EMBED, FFN)   # width of the packed bias/LayerNorm vector slab


def _layer_norm(x, w, b):
    # torch.nn.LayerNorm over last dim, biased variance, eps=1e-5
    mu = jnp.mean(x, axis=-1, keepdims=True)
    xc = x - mu
    var = jnp.mean(xc * xc, axis=-1, keepdims=True)
    inv = jax.lax.rsqrt(var + LN_EPS)
    return xc * inv * w + b


def _gelu(x):
    # TODO(synk): PyTorch's default gelu is the exact erf form; tanh approximation used here.
    return jax.nn.gelu(x, approximate=True)


def encoder_layer_kernel(x_ref, bias_ref, wqkv_ref, wo_ref, w1_ref, w2_ref,
                         vec_ref, out_ref):
    f32 = jnp.float32
    bf16 = jnp.bfloat16

    x = x_ref[...]                      # (B*S, E) f32
    attn_bias = bias_ref[...]           # (B*S, B*S) f32, hoisted additive mask
    vecs = vec_ref[...]                 # (8, VEC_W) f32 packed vectors

    bqkv = vecs[0:1, :3 * EMBED]
    bo   = vecs[1:2, :EMBED]
    ln1w = vecs[2:3, :EMBED]
    ln1b = vecs[3:4, :EMBED]
    b1   = vecs[4:5, :FFN]
    b2   = vecs[5:6, :EMBED]
    ln2w = vecs[6:7, :EMBED]
    ln2b = vecs[7:8, :EMBED]

    # ---- fused QKV projection (q part of wqkv/bqkv pre-scaled by head_dim**-0.5)
    qkv = jnp.dot(x.astype(bf16), wqkv_ref[...],
                  preferred_element_type=f32) + bqkv             # (B*S, 3E)
    q = qkv[:, 0:EMBED].astype(bf16)
    k = qkv[:, EMBED:2 * EMBED].astype(bf16)
    v = qkv[:, 2 * EMBED:3 * EMBED].astype(bf16)

    # ---- self attention over the flattened (B*S) axis, per head -------------
    wo = wo_ref[...]                                             # (E, E) bf16
    attn = jnp.zeros(x.shape, f32)
    for h in range(HEADS):
        lo = h * HEAD_DIM
        qh = q[:, lo:lo + HEAD_DIM]
        kh = k[:, lo:lo + HEAD_DIM]
        vh = v[:, lo:lo + HEAD_DIM]
        # scores (B*S, B*S); additive bias keeps attention block-diagonal in
        # batch and masks padded keys with a large finite negative.
        s = jax.lax.dot_general(qh, kh, (((1,), (1,)), ((), ())),
                                preferred_element_type=f32) + attn_bias
        m = jnp.max(s, axis=-1, keepdims=True)
        e = jnp.exp(s - m)
        p = e * pl.reciprocal(jnp.sum(e, axis=-1, keepdims=True), approx=True)
        ctx = jnp.dot(p.astype(bf16), vh, preferred_element_type=f32)  # (B*S, hd)
        # accumulate the output projection per head (sublane slice of wo;
        # no lane-axis concat of 8-wide head outputs).
        attn = attn + jnp.dot(ctx.astype(bf16), wo[lo:lo + HEAD_DIM, :],
                              preferred_element_type=f32)
    attn = attn + bo

    # ---- post-LN residual block 1 (dropout == identity in eval) -------------
    x1 = _layer_norm(x + attn, ln1w, ln1b)

    # ---- feed forward --------------------------------------------------------
    h1 = _gelu(jnp.dot(x1.astype(bf16), w1_ref[...], preferred_element_type=f32) + b1)
    h2 = jnp.dot(h1.astype(bf16), w2_ref[...], preferred_element_type=f32) + b2
    out_ref[...] = _layer_norm(x1 + h2, ln2w, ln2b).astype(out_ref.dtype)


# ---------------- parameters ---------------------------------------------------
def init_params(key):
    ks = jax.random.split(key, 6)
    std = 0.02
    return {
        # projections stored as (in, out) so the kernel computes x @ W + b
        "wq": jax.random.normal(ks[0], (EMBED, EMBED), jnp.float32) * std,
        "wk": jax.random.normal(ks[1], (EMBED, EMBED), jnp.float32) * std,
        "wv": jax.random.normal(ks[2], (EMBED, EMBED), jnp.float32) * std,
        "wo": jax.random.normal(ks[3], (EMBED, EMBED), jnp.float32) * std,
        "bq": jnp.zeros((EMBED,), jnp.float32),
        "bk": jnp.zeros((EMBED,), jnp.float32),
        "bv": jnp.zeros((EMBED,), jnp.float32),
        "bo": jnp.zeros((EMBED,), jnp.float32),
        "ln1w": jnp.ones((EMBED,), jnp.float32),
        "ln1b": jnp.zeros((EMBED,), jnp.float32),
        "w1": jax.random.normal(ks[4], (EMBED, FFN), jnp.float32) * std,
        "b1": jnp.zeros((FFN,), jnp.float32),
        "w2": jax.random.normal(ks[5], (FFN, EMBED), jnp.float32) * std,
        "b2": jnp.zeros((EMBED,), jnp.float32),
        "ln2w": jnp.ones((EMBED,), jnp.float32),
        "ln2b": jnp.zeros((EMBED,), jnp.float32),
    }


def pack_params(p):
    """One-time packing of per-tensor params into the kernel's fused layout."""
    # Fused QKV; attention scaling folded into the q weights/bias:
    # (x @ Wq + bq) * s == x @ (Wq*s) + bq*s  (scaling applied after bias in BART).
    wqkv = jnp.concatenate([p["wq"] * SCALING, p["wk"], p["wv"]], axis=1)   # (E, 3E)
    bqkv = jnp.concatenate([p["bq"] * SCALING, p["bk"], p["bv"]], axis=0)   # (3E,)

    def row(v):
        v = v.astype(jnp.float32)
        return jnp.pad(v, (0, VEC_W - v.shape[0]))

    vecs = jnp.stack([row(bqkv), row(p["bo"]), row(p["ln1w"]), row(p["ln1b"]),
                      row(p["b1"]), row(p["b2"]), row(p["ln2w"]), row(p["ln2b"])])

    return {
        "wqkv": wqkv.astype(jnp.bfloat16),      # bf16 MXU feed, f32 accumulation
        "wo": p["wo"].astype(jnp.bfloat16),
        "w1": p["w1"].astype(jnp.bfloat16),
        "w2": p["w2"].astype(jnp.bfloat16),
        "vecs": vecs,                           # f32 (VPU adds / LayerNorm)
    }


# ---------------- wrapper ------------------------------------------------------
@jax.jit
def encoder_layer(x_sbe, encoder_padding_mask, packed):
    """x_sbe: (seq_len, batch, embed_dim) f32;
       encoder_padding_mask: (batch, seq_len), 1 = padding (excluded)."""
    S, B, E = x_sbe.shape
    x = jnp.transpose(x_sbe, (1, 0, 2)).reshape(B * S, E).astype(jnp.float32)

    # Additive attention bias over the flattened (B*S) key axis, computed once
    # (tiny, off the kernel critical path): cross-batch pairs and padded keys.
    mask_f = encoder_padding_mask.astype(jnp.float32)                     # (B, S)
    same_batch = jnp.eye(B, dtype=jnp.float32)[:, None, :, None]          # (B,1,B,1)
    pad_bias = jnp.where(mask_f > 0.5, NEG_PADDED_KEY, 0.0)[None, None, :, :]
    bias = jnp.where(same_batch > 0.5, 0.0, NEG_CROSS_BATCH) + pad_bias   # (B,1,B,S)
    bias = jnp.broadcast_to(bias, (B, S, B, S)).reshape(B * S, B * S)

    vmem = pl.BlockSpec(memory_space=pltpu.MemorySpace.VMEM)
    out = pl.pallas_call(
        encoder_layer_kernel,
        out_shape=jax.ShapeDtypeStruct((B * S, E), jnp.float32),
        in_specs=[vmem] * 7,
        out_specs=vmem,
    )(x, bias, packed["wqkv"], packed["wo"], packed["w1"], packed["w2"],
      packed["vecs"])

    return out.reshape(B, S, E).transpose(1, 0, 2)       # back to (S, B, E)


if __name__ == "__main__":
    key = jax.random.PRNGKey(0)
    kx, kp = jax.random.split(key)

    x = jax.random.normal(kx, (SEQ, BATCH, EMBED), jnp.float32)
    # padding mask: batch 0 fully visible, batch 1 has the last two tokens padded
    pad_mask = jnp.array(
        [[0] * SEQ,
         [0] * (SEQ - 2) + [1, 1]], dtype=jnp.int32)

    params = init_params(kp)
    packed = pack_params(params)          # one-time packing, outside the jit'd call

    out = encoder_layer(x, pad_mask, packed)
    out = jax.block_until_ready(out)
    assert out.shape == (SEQ, BATCH, EMBED)
    assert bool(jnp.all(jnp.isfinite(out)))
    print("KERNEL_OK")
</pallas_src>

<mosaic_0001>
module attributes {stable_mosaic.version = 11 : i64} {
  func.func @encoder_layer_kernel(%arg0: memref<16x32xf32, #tpu.memory_space<vmem>>, %arg1: memref<16x16xf32, #tpu.memory_space<vmem>>, %arg2: memref<32x96xbf16, #tpu.memory_space<vmem>>, %arg3: memref<32x32xbf16, #tpu.memory_space<vmem>>, %arg4: memref<32x64xbf16, #tpu.memory_space<vmem>>, %arg5: memref<64x32xbf16, #tpu.memory_space<vmem>>, %arg6: memref<8x96xf32, #tpu.memory_space<vmem>>, %arg7: memref<16x32xf32, #tpu.memory_space<vmem>>) attributes {dimension_semantics = [], scalar_prefetch = 0 : i64, scratch_operands = 0 : i64, tpu.core_type = #tpu.core_type<tc>} {
    %c0 = arith.constant 0 : index
    %c0_0 = arith.constant 0 : index
    %0 = vector.load %arg0[%c0, %c0_0] : memref<16x32xf32, #tpu.memory_space<vmem>>, vector<16x32xf32>
    %c0_1 = arith.constant 0 : index
    %c0_2 = arith.constant 0 : index
    %1 = vector.load %arg1[%c0_1, %c0_2] : memref<16x16xf32, #tpu.memory_space<vmem>>, vector<16x16xf32>
    %2 = vector.shape_cast %1 : vector<16x16xf32> to vector<16x16xf32>
    %c0_3 = arith.constant 0 : index
    %c0_4 = arith.constant 0 : index
    %3 = vector.load %arg6[%c0_3, %c0_4] : memref<8x96xf32, #tpu.memory_space<vmem>>, vector<8x96xf32>
    %4 = vector.extract_strided_slice %3 {offsets = [0, 0], sizes = [1, 96], strides = [1, 1]} : vector<8x96xf32> to vector<1x96xf32>
    %5 = vector.extract_strided_slice %3 {offsets = [1, 0], sizes = [1, 32], strides = [1, 1]} : vector<8x96xf32> to vector<1x32xf32>
    %6 = vector.extract_strided_slice %3 {offsets = [2, 0], sizes = [1, 32], strides = [1, 1]} : vector<8x96xf32> to vector<1x32xf32>
    %7 = vector.extract_strided_slice %3 {offsets = [3, 0], sizes = [1, 32], strides = [1, 1]} : vector<8x96xf32> to vector<1x32xf32>
    %8 = vector.extract_strided_slice %3 {offsets = [4, 0], sizes = [1, 64], strides = [1, 1]} : vector<8x96xf32> to vector<1x64xf32>
    %9 = vector.extract_strided_slice %3 {offsets = [5, 0], sizes = [1, 32], strides = [1, 1]} : vector<8x96xf32> to vector<1x32xf32>
    %10 = vector.extract_strided_slice %3 {offsets = [6, 0], sizes = [1, 32], strides = [1, 1]} : vector<8x96xf32> to vector<1x32xf32>
    %11 = vector.extract_strided_slice %3 {offsets = [7, 0], sizes = [1, 32], strides = [1, 1]} : vector<8x96xf32> to vector<1x32xf32>
    %12 = arith.truncf %0 : vector<16x32xf32> to vector<16x32xbf16>
    %c0_5 = arith.constant 0 : index
    %c0_6 = arith.constant 0 : index
    %13 = vector.load %arg2[%c0_5, %c0_6] : memref<32x96xbf16, #tpu.memory_space<vmem>>, vector<32x96xbf16>
    %cst = arith.constant dense<0.000000e+00> : vector<16x96xf32>
    %14 = tpu.matmul %12, %13, %cst {dimension_numbers = #tpu.dot_dimension_numbers<[1], [0], [0], [1], [0, 0, 1, 1], [], []>} : vector<16x32xbf16>, vector<32x96xbf16>, vector<16x96xf32> -> vector<16x96xf32>
    %15 = vector.broadcast %4 : vector<1x96xf32> to vector<16x96xf32>
    %16 = arith.addf %14, %15 : vector<16x96xf32>
    %17 = vector.extract_strided_slice %16 {offsets = [0, 0], sizes = [16, 32], strides = [1, 1]} : vector<16x96xf32> to vector<16x32xf32>
    %18 = arith.truncf %17 : vector<16x32xf32> to vector<16x32xbf16>
    %19 = vector.extract_strided_slice %16 {offsets = [0, 32], sizes = [16, 32], strides = [1, 1]} : vector<16x96xf32> to vector<16x32xf32>
    %20 = arith.truncf %19 : vector<16x32xf32> to vector<16x32xbf16>
    %21 = vector.extract_strided_slice %16 {offsets = [0, 64], sizes = [16, 32], strides = [1, 1]} : vector<16x96xf32> to vector<16x32xf32>
    %22 = arith.truncf %21 : vector<16x32xf32> to vector<16x32xbf16>
    %c0_7 = arith.constant 0 : index
    %c0_8 = arith.constant 0 : index
    %23 = vector.load %arg3[%c0_7, %c0_8] : memref<32x32xbf16, #tpu.memory_space<vmem>>, vector<32x32xbf16>
    %cst_9 = arith.constant 0.000000e+00 : f32
    %24 = vector.broadcast %cst_9 : f32 to vector<16x32xf32>
    %25 = vector.extract_strided_slice %18 {offsets = [0, 0], sizes = [16, 8], strides = [1, 1]} : vector<16x32xbf16> to vector<16x8xbf16>
    %26 = vector.extract_strided_slice %20 {offsets = [0, 0], sizes = [16, 8], strides = [1, 1]} : vector<16x32xbf16> to vector<16x8xbf16>
    %27 = vector.extract_strided_slice %22 {offsets = [0, 0], sizes = [16, 8], strides = [1, 1]} : vector<16x32xbf16> to vector<16x8xbf16>
    %cst_10 = arith.constant dense<0.000000e+00> : vector<16x16xf32>
    %28 = tpu.matmul %25, %26, %cst_10 {dimension_numbers = #tpu.dot_dimension_numbers<[1], [1], [0], [0], [0, 0, 1, 0], [], []>} : vector<16x8xbf16>, vector<16x8xbf16>, vector<16x16xf32> -> vector<16x16xf32>
    %29 = arith.addf %28, %2 : vector<16x16xf32>
    %cst_11 = arith.constant dense<0xFF800000> : vector<16xf32>
    %30 = vector.multi_reduction <maximumf>, %29, %cst_11 [1] : vector<16x16xf32> to vector<16xf32>
    %31 = vector.shape_cast %30 : vector<16xf32> to vector<16x1xf32>
    %32 = vector.broadcast %31 : vector<16x1xf32> to vector<16x16xf32>
    %33 = arith.subf %29, %32 : vector<16x16xf32>
    %34 = math.exp %33 : vector<16x16xf32>
    %cst_12 = arith.constant dense<0.000000e+00> : vector<16xf32>
    %35 = vector.multi_reduction <add>, %34, %cst_12 [1] : vector<16x16xf32> to vector<16xf32>
    %36 = vector.shape_cast %35 : vector<16xf32> to vector<16x1xf32>
    %37 = tpu.reciprocal %36 {approx = true} : vector<16x1xf32> -> vector<16x1xf32>
    %38 = vector.broadcast %37 : vector<16x1xf32> to vector<16x16xf32>
    %39 = arith.mulf %34, %38 : vector<16x16xf32>
    %40 = arith.truncf %39 : vector<16x16xf32> to vector<16x16xbf16>
    %cst_13 = arith.constant dense<0.000000e+00> : vector<16x8xf32>
    %41 = tpu.matmul %40, %27, %cst_13 {dimension_numbers = #tpu.dot_dimension_numbers<[1], [0], [0], [1], [0, 0, 1, 1], [], []>} : vector<16x16xbf16>, vector<16x8xbf16>, vector<16x8xf32> -> vector<16x8xf32>
    %42 = arith.truncf %41 : vector<16x8xf32> to vector<16x8xbf16>
    %43 = vector.extract_strided_slice %23 {offsets = [0, 0], sizes = [8, 32], strides = [1, 1]} : vector<32x32xbf16> to vector<8x32xbf16>
    %cst_14 = arith.constant dense<0.000000e+00> : vector<16x32xf32>
    %44 = tpu.matmul %42, %43, %cst_14 {dimension_numbers = #tpu.dot_dimension_numbers<[1], [0], [0], [1], [0, 0, 1, 1], [], []>} : vector<16x8xbf16>, vector<8x32xbf16>, vector<16x32xf32> -> vector<16x32xf32>
    %45 = arith.addf %24, %44 : vector<16x32xf32>
    %46 = vector.extract_strided_slice %18 {offsets = [0, 8], sizes = [16, 8], strides = [1, 1]} : vector<16x32xbf16> to vector<16x8xbf16>
    %47 = vector.extract_strided_slice %20 {offsets = [0, 8], sizes = [16, 8], strides = [1, 1]} : vector<16x32xbf16> to vector<16x8xbf16>
    %48 = vector.extract_strided_slice %22 {offsets = [0, 8], sizes = [16, 8], strides = [1, 1]} : vector<16x32xbf16> to vector<16x8xbf16>
    %cst_15 = arith.constant dense<0.000000e+00> : vector<16x16xf32>
    %49 = tpu.matmul %46, %47, %cst_15 {dimension_numbers = #tpu.dot_dimension_numbers<[1], [1], [0], [0], [0, 0, 1, 0], [], []>} : vector<16x8xbf16>, vector<16x8xbf16>, vector<16x16xf32> -> vector<16x16xf32>
    %50 = arith.addf %49, %2 : vector<16x16xf32>
    %cst_16 = arith.constant dense<0xFF800000> : vector<16xf32>
    %51 = vector.multi_reduction <maximumf>, %50, %cst_16 [1] : vector<16x16xf32> to vector<16xf32>
    %52 = vector.shape_cast %51 : vector<16xf32> to vector<16x1xf32>
    %53 = vector.broadcast %52 : vector<16x1xf32> to vector<16x16xf32>
    %54 = arith.subf %50, %53 : vector<16x16xf32>
    %55 = math.exp %54 : vector<16x16xf32>
    %cst_17 = arith.constant dense<0.000000e+00> : vector<16xf32>
    %56 = vector.multi_reduction <add>, %55, %cst_17 [1] : vector<16x16xf32> to vector<16xf32>
    %57 = vector.shape_cast %56 : vector<16xf32> to vector<16x1xf32>
    %58 = tpu.reciprocal %57 {approx = true} : vector<16x1xf32> -> vector<16x1xf32>
    %59 = vector.broadcast %58 : vector<16x1xf32> to vector<16x16xf32>
    %60 = arith.mulf %55, %59 : vector<16x16xf32>
    %61 = arith.truncf %60 : vector<16x16xf32> to vector<16x16xbf16>
    %cst_18 = arith.constant dense<0.000000e+00> : vector<16x8xf32>
    %62 = tpu.matmul %61, %48, %cst_18 {dimension_numbers = #tpu.dot_dimension_numbers<[1], [0], [0], [1], [0, 0, 1, 1], [], []>} : vector<16x16xbf16>, vector<16x8xbf16>, vector<16x8xf32> -> vector<16x8xf32>
    %63 = arith.truncf %62 : vector<16x8xf32> to vector<16x8xbf16>
    %64 = vector.extract_strided_slice %23 {offsets = [8, 0], sizes = [8, 32], strides = [1, 1]} : vector<32x32xbf16> to vector<8x32xbf16>
    %cst_19 = arith.constant dense<0.000000e+00> : vector<16x32xf32>
    %65 = tpu.matmul %63, %64, %cst_19 {dimension_numbers = #tpu.dot_dimension_numbers<[1], [0], [0], [1], [0, 0, 1, 1], [], []>} : vector<16x8xbf16>, vector<8x32xbf16>, vector<16x32xf32> -> vector<16x32xf32>
    %66 = arith.addf %45, %65 : vector<16x32xf32>
    %67 = vector.extract_strided_slice %18 {offsets = [0, 16], sizes = [16, 8], strides = [1, 1]} : vector<16x32xbf16> to vector<16x8xbf16>
    %68 = vector.extract_strided_slice %20 {offsets = [0, 16], sizes = [16, 8], strides = [1, 1]} : vector<16x32xbf16> to vector<16x8xbf16>
    %69 = vector.extract_strided_slice %22 {offsets = [0, 16], sizes = [16, 8], strides = [1, 1]} : vector<16x32xbf16> to vector<16x8xbf16>
    %cst_20 = arith.constant dense<0.000000e+00> : vector<16x16xf32>
    %70 = tpu.matmul %67, %68, %cst_20 {dimension_numbers = #tpu.dot_dimension_numbers<[1], [1], [0], [0], [0, 0, 1, 0], [], []>} : vector<16x8xbf16>, vector<16x8xbf16>, vector<16x16xf32> -> vector<16x16xf32>
    %71 = arith.addf %70, %2 : vector<16x16xf32>
    %cst_21 = arith.constant dense<0xFF800000> : vector<16xf32>
    %72 = vector.multi_reduction <maximumf>, %71, %cst_21 [1] : vector<16x16xf32> to vector<16xf32>
    %73 = vector.shape_cast %72 : vector<16xf32> to vector<16x1xf32>
    %74 = vector.broadcast %73 : vector<16x1xf32> to vector<16x16xf32>
    %75 = arith.subf %71, %74 : vector<16x16xf32>
    %76 = math.exp %75 : vector<16x16xf32>
    %cst_22 = arith.constant dense<0.000000e+00> : vector<16xf32>
    %77 = vector.multi_reduction <add>, %76, %cst_22 [1] : vector<16x16xf32> to vector<16xf32>
    %78 = vector.shape_cast %77 : vector<16xf32> to vector<16x1xf32>
    %79 = tpu.reciprocal %78 {approx = true} : vector<16x1xf32> -> vector<16x1xf32>
    %80 = vector.broadcast %79 : vector<16x1xf32> to vector<16x16xf32>
    %81 = arith.mulf %76, %80 : vector<16x16xf32>
    %82 = arith.truncf %81 : vector<16x16xf32> to vector<16x16xbf16>
    %cst_23 = arith.constant dense<0.000000e+00> : vector<16x8xf32>
    %83 = tpu.matmul %82, %69, %cst_23 {dimension_numbers = #tpu.dot_dimension_numbers<[1], [0], [0], [1], [0, 0, 1, 1], [], []>} : vector<16x16xbf16>, vector<16x8xbf16>, vector<16x8xf32> -> vector<16x8xf32>
    %84 = arith.truncf %83 : vector<16x8xf32> to vector<16x8xbf16>
    %85 = vector.extract_strided_slice %23 {offsets = [16, 0], sizes = [8, 32], strides = [1, 1]} : vector<32x32xbf16> to vector<8x32xbf16>
    %cst_24 = arith.constant dense<0.000000e+00> : vector<16x32xf32>
    %86 = tpu.matmul %84, %85, %cst_24 {dimension_numbers = #tpu.dot_dimension_numbers<[1], [0], [0], [1], [0, 0, 1, 1], [], []>} : vector<16x8xbf16>, vector<8x32xbf16>, vector<16x32xf32> -> vector<16x32xf32>
    %87 = arith.addf %66, %86 : vector<16x32xf32>
    %88 = vector.extract_strided_slice %18 {offsets = [0, 24], sizes = [16, 8], strides = [1, 1]} : vector<16x32xbf16> to vector<16x8xbf16>
    %89 = vector.extract_strided_slice %20 {offsets = [0, 24], sizes = [16, 8], strides = [1, 1]} : vector<16x32xbf16> to vector<16x8xbf16>
    %90 = vector.extract_strided_slice %22 {offsets = [0, 24], sizes = [16, 8], strides = [1, 1]} : vector<16x32xbf16> to vector<16x8xbf16>
    %cst_25 = arith.constant dense<0.000000e+00> : vector<16x16xf32>
    %91 = tpu.matmul %88, %89, %cst_25 {dimension_numbers = #tpu.dot_dimension_numbers<[1], [1], [0], [0], [0, 0, 1, 0], [], []>} : vector<16x8xbf16>, vector<16x8xbf16>, vector<16x16xf32> -> vector<16x16xf32>
    %92 = arith.addf %91, %2 : vector<16x16xf32>
    %cst_26 = arith.constant dense<0xFF800000> : vector<16xf32>
    %93 = vector.multi_reduction <maximumf>, %92, %cst_26 [1] : vector<16x16xf32> to vector<16xf32>
    %94 = vector.shape_cast %93 : vector<16xf32> to vector<16x1xf32>
    %95 = vector.broadcast %94 : vector<16x1xf32> to vector<16x16xf32>
    %96 = arith.subf %92, %95 : vector<16x16xf32>
    %97 = math.exp %96 : vector<16x16xf32>
    %cst_27 = arith.constant dense<0.000000e+00> : vector<16xf32>
    %98 = vector.multi_reduction <add>, %97, %cst_27 [1] : vector<16x16xf32> to vector<16xf32>
    %99 = vector.shape_cast %98 : vector<16xf32> to vector<16x1xf32>
    %100 = tpu.reciprocal %99 {approx = true} : vector<16x1xf32> -> vector<16x1xf32>
    %101 = vector.broadcast %100 : vector<16x1xf32> to vector<16x16xf32>
    %102 = arith.mulf %97, %101 : vector<16x16xf32>
    %103 = arith.truncf %102 : vector<16x16xf32> to vector<16x16xbf16>
    %cst_28 = arith.constant dense<0.000000e+00> : vector<16x8xf32>
    %104 = tpu.matmul %103, %90, %cst_28 {dimension_numbers = #tpu.dot_dimension_numbers<[1], [0], [0], [1], [0, 0, 1, 1], [], []>} : vector<16x16xbf16>, vector<16x8xbf16>, vector<16x8xf32> -> vector<16x8xf32>
    %105 = arith.truncf %104 : vector<16x8xf32> to vector<16x8xbf16>
    %106 = vector.extract_strided_slice %23 {offsets = [24, 0], sizes = [8, 32], strides = [1, 1]} : vector<32x32xbf16> to vector<8x32xbf16>
    %cst_29 = arith.constant dense<0.000000e+00> : vector<16x32xf32>
    %107 = tpu.matmul %105, %106, %cst_29 {dimension_numbers = #tpu.dot_dimension_numbers<[1], [0], [0], [1], [0, 0, 1, 1], [], []>} : vector<16x8xbf16>, vector<8x32xbf16>, vector<16x32xf32> -> vector<16x32xf32>
    %108 = arith.addf %87, %107 : vector<16x32xf32>
    %109 = vector.broadcast %5 : vector<1x32xf32> to vector<16x32xf32>
    %110 = arith.addf %108, %109 : vector<16x32xf32>
    %111 = arith.addf %0, %110 : vector<16x32xf32>
    %cst_30 = arith.constant dense<0.000000e+00> : vector<16xf32>
    %112 = vector.multi_reduction <add>, %111, %cst_30 [1] : vector<16x32xf32> to vector<16xf32>
    %113 = vector.shape_cast %112 : vector<16xf32> to vector<16x1xf32>
    %cst_31 = arith.constant 3.200000e+01 : f32
    %114 = vector.broadcast %cst_31 : f32 to vector<16x1xf32>
    %115 = arith.divf %113, %114 : vector<16x1xf32>
    %116 = vector.broadcast %115 : vector<16x1xf32> to vector<16x32xf32>
    %117 = arith.subf %111, %116 : vector<16x32xf32>
    %118 = arith.mulf %117, %117 : vector<16x32xf32>
    %cst_32 = arith.constant dense<0.000000e+00> : vector<16xf32>
    %119 = vector.multi_reduction <add>, %118, %cst_32 [1] : vector<16x32xf32> to vector<16xf32>
    %120 = vector.shape_cast %119 : vector<16xf32> to vector<16x1xf32>
    %cst_33 = arith.constant 3.200000e+01 : f32
    %121 = vector.broadcast %cst_33 : f32 to vector<16x1xf32>
    %122 = arith.divf %120, %121 : vector<16x1xf32>
    %cst_34 = arith.constant 9.99999974E-6 : f32
    %123 = vector.broadcast %cst_34 : f32 to vector<16x1xf32>
    %124 = arith.addf %122, %123 : vector<16x1xf32>
    %125 = math.rsqrt %124 : vector<16x1xf32>
    %126 = vector.broadcast %125 : vector<16x1xf32> to vector<16x32xf32>
    %127 = arith.mulf %117, %126 : vector<16x32xf32>
    %128 = vector.broadcast %6 : vector<1x32xf32> to vector<16x32xf32>
    %129 = arith.mulf %127, %128 : vector<16x32xf32>
    %130 = vector.broadcast %7 : vector<1x32xf32> to vector<16x32xf32>
    %131 = arith.addf %129, %130 : vector<16x32xf32>
    %132 = arith.truncf %131 : vector<16x32xf32> to vector<16x32xbf16>
    %c0_35 = arith.constant 0 : index
    %c0_36 = arith.constant 0 : index
    %133 = vector.load %arg4[%c0_35, %c0_36] : memref<32x64xbf16, #tpu.memory_space<vmem>>, vector<32x64xbf16>
    %cst_37 = arith.constant dense<0.000000e+00> : vector<16x64xf32>
    %134 = tpu.matmul %132, %133, %cst_37 {dimension_numbers = #tpu.dot_dimension_numbers<[1], [0], [0], [1], [0, 0, 1, 1], [], []>} : vector<16x32xbf16>, vector<32x64xbf16>, vector<16x64xf32> -> vector<16x64xf32>
    %135 = vector.broadcast %8 : vector<1x64xf32> to vector<16x64xf32>
    %136 = arith.addf %134, %135 : vector<16x64xf32>
    %137 = arith.mulf %136, %136 : vector<16x64xf32>
    %138 = arith.mulf %136, %137 : vector<16x64xf32>
    %cst_38 = arith.constant 4.471500e-02 : f32
    %139 = vector.broadcast %cst_38 : f32 to vector<16x64xf32>
    %140 = arith.mulf %139, %138 : vector<16x64xf32>
    %141 = arith.addf %136, %140 : vector<16x64xf32>
    %cst_39 = arith.constant 0.797884583 : f32
    %142 = vector.broadcast %cst_39 : f32 to vector<16x64xf32>
    %143 = arith.mulf %142, %141 : vector<16x64xf32>
    %144 = math.tanh %143 : vector<16x64xf32>
    %cst_40 = arith.constant 1.000000e+00 : f32
    %145 = vector.broadcast %cst_40 : f32 to vector<16x64xf32>
    %146 = arith.addf %145, %144 : vector<16x64xf32>
    %cst_41 = arith.constant 5.000000e-01 : f32
    %147 = vector.broadcast %cst_41 : f32 to vector<16x64xf32>
    %148 = arith.mulf %147, %146 : vector<16x64xf32>
    %149 = arith.mulf %136, %148 : vector<16x64xf32>
    %150 = arith.truncf %149 : vector<16x64xf32> to vector<16x64xbf16>
    %c0_42 = arith.constant 0 : index
    %c0_43 = arith.constant 0 : index
    %151 = vector.load %arg5[%c0_42, %c0_43] : memref<64x32xbf16, #tpu.memory_space<vmem>>, vector<64x32xbf16>
    %cst_44 = arith.constant dense<0.000000e+00> : vector<16x32xf32>
    %152 = tpu.matmul %150, %151, %cst_44 {dimension_numbers = #tpu.dot_dimension_numbers<[1], [0], [0], [1], [0, 0, 1, 1], [], []>} : vector<16x64xbf16>, vector<64x32xbf16>, vector<16x32xf32> -> vector<16x32xf32>
    %153 = vector.broadcast %9 : vector<1x32xf32> to vector<16x32xf32>
    %154 = arith.addf %152, %153 : vector<16x32xf32>
    %155 = arith.addf %131, %154 : vector<16x32xf32>
    %cst_45 = arith.constant dense<0.000000e+00> : vector<16xf32>
    %156 = vector.multi_reduction <add>, %155, %cst_45 [1] : vector<16x32xf32> to vector<16xf32>
    %157 = vector.shape_cast %156 : vector<16xf32> to vector<16x1xf32>
    %cst_46 = arith.constant 3.200000e+01 : f32
    %158 = vector.broadcast %cst_46 : f32 to vector<16x1xf32>
    %159 = arith.divf %157, %158 : vector<16x1xf32>
    %160 = vector.broadcast %159 : vector<16x1xf32> to vector<16x32xf32>
    %161 = arith.subf %155, %160 : vector<16x32xf32>
    %162 = arith.mulf %161, %161 : vector<16x32xf32>
    %cst_47 = arith.constant dense<0.000000e+00> : vector<16xf32>
    %163 = vector.multi_reduction <add>, %162, %cst_47 [1] : vector<16x32xf32> to vector<16xf32>
    %164 = vector.shape_cast %163 : vector<16xf32> to vector<16x1xf32>
    %cst_48 = arith.constant 3.200000e+01 : f32
    %165 = vector.broadcast %cst_48 : f32 to vector<16x1xf32>
    %166 = arith.divf %164, %165 : vector<16x1xf32>
    %cst_49 = arith.constant 9.99999974E-6 : f32
    %167 = vector.broadcast %cst_49 : f32 to vector<16x1xf32>
    %168 = arith.addf %166, %167 : vector<16x1xf32>
    %169 = math.rsqrt %168 : vector<16x1xf32>
    %170 = vector.broadcast %169 : vector<16x1xf32> to vector<16x32xf32>
    %171 = arith.mulf %161, %170 : vector<16x32xf32>
    %172 = vector.broadcast %10 : vector<1x32xf32> to vector<16x32xf32>
    %173 = arith.mulf %171, %172 : vector<16x32xf32>
    %174 = vector.broadcast %11 : vector<1x32xf32> to vector<16x32xf32>
    %175 = arith.addf %173, %174 : vector<16x32xf32>
    %c0_50 = arith.constant 0 : index
    %c0_51 = arith.constant 0 : index
    %176 = vector.load %arg7[%c0_50, %c0_51] : memref<16x32xf32, #tpu.memory_space<vmem>>, vector<16x32xf32>
    tpu.vector_store %arg7[%c0_50, %c0_51], %175 {strides = array<i32>} : memref<16x32xf32, #tpu.memory_space<vmem>>, vector<16x32xf32>,
    return
  }
}

</mosaic_0001>

<bundles_post_ra>
// kernel: encoder_layer.1
= control target key start
LH: loop header
LB: loop body
LE: loop exit
PB: predicated region body
PF: predicated region fallthrough
CT: control target
= control target key end

     0   :  { %v1266_v0 = vmov 0.0   ;;  %vm1267_vm0 = vmmov 0   ;;  %vm53_vm1 = vcmask 261120   ;;  %v37_v6 = vlaneseq  ;;  %s1268_s9 = smov 120   ;;  %s1269_s10 = smov 96   ;;  %s1534_s2 = inlined_call_operand.vmem [shape: bf16[32,96], index: 2, kind: input, shape index: {}]   ;;  %s1535_s0 = inlined_call_operand.vmem [shape: f32[16,32], index: 0, kind: input, shape index: {}]   ;;  %s1536_s6 = inlined_call_operand.vmem [shape: f32[8,96], index: 6, kind: input, shape index: {}]   ;;  %s1537_s1 = inlined_call_operand.vmem [shape: f32[16,16], index: 1, kind: input, shape index: {}]   ;;  %s1538_s3 = inlined_call_operand.vmem [shape: bf16[32,32], index: 3, kind: input, shape index: {}]   ;;  %s1539_s4 = inlined_call_operand.vmem [shape: bf16[32,64], index: 4, kind: input, shape index: {}]   ;;  %s1540_s5 = inlined_call_operand.vmem [shape: bf16[64,32], index: 5, kind: input, shape index: {}]   ;;  %s1541_s7 = inlined_call_operand.vmem [shape: f32[16,32], index: 7, kind: output, shape index: {}]  }
   0x1   :  { %1101 = vmatprep.subr.bf16.mxu1 %v1266_v0  ;;  %v1214_v1 = vld [vmem:[%s1534_s2] sm:$0xff]   ;;  %1105 = vmatprep.mubr.msk.bf16.mxu1 %vm1267_vm0, %v1266_v0  ;;  %v1215_v2 = vld [vmem:[%s1534_s2 + $0x8] sm:$0xff]   ;;  %s1270_s11 = smov 88   ;;  %vm106_vm2 = vcmask 64512   ;;  %vm154_vm3 = vcmask 130048   ;;  %s1272_s15 = smov 64  }
   0x2   :  { %1115 = vmatprep.subr.bf16.mxu0 %v1266_v0  ;;  %1117 = vmatprep.mubr.msk.bf16.mxu0 %vm1267_vm0, %v1266_v0  ;;  %v1334_v3 = vld [vmem:[%s1535_s0] sm:$0xff]  ;;  %v1339_v4 = vld [vmem:[%s1535_s0 + $0x8] sm:$0xff]  ;;  %v1348_v7 = vshrl.u32 %v37_v6, 7  ;;  %s1273_s16 = smov 80   ;;  %s1274_s17 = smov 112   ;;  %vm351_vm4 = vcmask 1043456  }
   0x3   :  { %1102 = vmatpush3.bf16.msra.mxu1 %v1214_v1  ;;  %v32_v5 = vpack.c.bf16 %v1339_v4, %v1334_v3  ;;  %v1354_v9 = vld [vmem:[%s1536_s6] sm:$0xff]  ;;  %v1381_v25 = vld [vmem:[%s1537_s1 + $0x8] sm:$0xff]  ;;  %s1275_s22 = smov 72   ;;  %s1276_s23 = smov 48   ;;  %vm952_vm5 = vcmask 523264  }
   0x4   :  { %1103 = vmatprep.subr.bf16.mxu1 %v1266_v0  ;;  %v39_v8 = vsub.s32 0, %v1348_v7  ;;  %v1376_v23 = vld [vmem:[%s1537_s1] sm:$0xff]  ;;  %s1271_s1 = smov 56   ;;  %s1277_s24 = smov 104  }
   0x5   :  { %s1278_s27 = smov 40  }
   0x6   :  { %v40_v10 = vrot.slane %v1354_v9, %v39_v8 }
   0x7   :  { %1104 = vmatpush3.bf16.msra.mxu1 %v1215_v2 }
   0x8   :  { %1109 = vmatprep.subr.bf16.mxu1 %v1266_v0 }
   0xa   :  { %1106 = vmatmul.mubr.msk.bf16.vlgmr.msra.gmra.mrb[0].mxu1 %vm53_vm1, %v32_v5 }
   0xb   :  { %1111 = vmatprep.mubr.msk.bf16.mxu1 %vm1267_vm0, %v1266_v0 }
  0xdd   :  { %v91_v11 = vpop.f32.mrb[0].mxu1 }
  0xde   :  { %v1107_v12 = vpop.f32.mrb[1].mxu1  ;;  %v92_v14 = vadd.f32 %v91_v11, %v40_v10 }
  0xdf   :  { %v94_v13 = vpop.f32.mrb[2].mxu1 }
  0xe0   :  { %v95_v15 = vadd.f32 %v94_v13, %v40_v10  ;;  %v1108_v16 = vpop.f32.mrb[3].mxu1 }
  0xe2   :  { %v1357_v17 = vpack.c.bf16 %v95_v15, %v92_v14 }
  0xe4   :  { %226 = vrot.lane.b32.xlu1 %v1357_v17, %s1268_s9  ;;  %104 = vrot.lane.b32.xlu0 %v1357_v17, %s1269_s10 }
  0xe8   :  { %228 = vrot.lane.b32.xlu0 %v1357_v17, %s1270_s11 }
 0x156   :  { %v105_v18 = vpop.permute.xlu0 %104  ;;  %v227_v22 = vpop.permute.xlu1 %226 }
 0x157   :  { %v111_v19 = vsel %vm106_vm2, %v105_v18, 0 }
 0x158   :  { %1110 = vmatpush3.bf16.xpose.msra.mxu1 %v111_v19  ;;  %v99_v19 = vld [vmem:[%s1538_s3] sm:$0xf] }
 0x159   :  { %1121 = vmatprep.subr.bf16.mxu1 %v1266_v0 }
 0x15a   :  { %v229_v20 = vpop.permute.xlu0 %228 }
 0x15b   :  { %v234_v21 = vsel %vm106_vm2, %v229_v20, 0  ;;  %v400_v20 = vsel %vm351_vm4, %v99_v19, 0  ;;  %v101_v19 = vld [vmem:[%s1538_s3 + $0x8] sm:$0xf] }
 0x15f   :  { %1112 = vmatmul.mubr.msk.bf16.vlgmr.msra.gmra.mrb[4].mxu1 %vm106_vm2, %v1357_v17 }
 0x160   :  { %1122 = vmatpush3.bf16.xpose.msra.mxu1 %v234_v21  ;;  %1123 = vmatprep.mubr.msk.bf16.mxu1 %vm1267_vm0, %v1266_v0  ;;  %v100_v21 = vld [vmem:[%s1538_s3 + $0x4] sm:$0xf] }
 0x161   :  { %1133 = vmatprep.subr.bf16.mxu1 %v1266_v0 }
 0x167   :  { %1124 = vmatmul.mubr.msk.bf16.vlgmr.msra.gmra.mrb[8].mxu1 %vm106_vm2, %v227_v22  ;;  %v353_v22 = vsel %vm351_vm4, %v100_v21, 0 }
 0x168   :  { %1135 = vmatprep.mubr.msk.bf16.mxu1 %vm1267_vm0, %v1266_v0  ;;  %1134 = vmatpush3.bf16.msra.mxu1 %v353_v22 }
 0x169   :  { %1145 = vmatprep.subr.bf16.mxu1 %v1266_v0 }
 0x232   :  { %v147_v24 = vpop.f32.mrb[4].mxu1 }
 0x233   :  { %v148_v26 = vadd.f32 %v147_v24, %v1376_v23  ;;  %v1113_v27 = vpop.f32.mrb[5].mxu1 }
 0x234   :  { %v150_v28 = vpop.f32.mrb[6].mxu1 }
 0x235   :  { %v151_v29 = vadd.f32 %v150_v28, %v1381_v25  ;;  %v1114_v30 = vpop.f32.mrb[7].mxu1  ;;  %v155_v31 = vsel %vm154_vm3, %v148_v26, -inf }
 0x236   :  { %156 = vmax.xlane.f32.xlu1 %v155_v31 }
 0x237   :  { %v158_v32 = vsel %vm154_vm3, %v151_v29, -inf }
 0x238   :  { %159 = vmax.xlane.f32.xlu0 %v158_v32 }
 0x23a   :  { %v270_v33 = vpop.f32.mrb[8].mxu1 }
 0x23b   :  { %v271_v34 = vadd.f32 %v270_v33, %v1376_v23  ;;  %v1125_v35 = vpop.f32.mrb[9].mxu1 }
 0x23c   :  { %v273_v36 = vpop.f32.mrb[10].mxu1 }
 0x23d   :  { %v274_v37 = vadd.f32 %v273_v36, %v1381_v25  ;;  %v1126_v38 = vpop.f32.mrb[11].mxu1  ;;  %v277_v39 = vsel %vm154_vm3, %v271_v34, -inf }
 0x23e   :  { %278 = vmax.xlane.f32.xlu0 %v277_v39 }
 0x23f   :  { %v280_v40 = vsel %vm154_vm3, %v274_v37, -inf }
 0x240   :  { %281 = vmax.xlane.f32.xlu1 %v280_v40 }
 0x2c3   :  { %v157_v41 = vpop.xlane.xlu1 %156 }
 0x2c4   :  { %v161_v42 = vsub.f32 %v148_v26, %v157_v41 }
 0x2c5   :  { %v160_v43 = vpop.xlane.xlu0 %159 }
 0x2c6   :  { %v163_v44 = vmul.f32 1.442695, %v161_v42  ;;  %v162_v45 = vsub.f32 %v151_v29, %v160_v43 }
 0x2c8   :  { %1222 = vpow2.f32 %v163_v44  ;;  %v165_v46 = vmul.f32 1.442695, %v162_v45 }
 0x2ca   :  { %1224 = vpow2.f32 %v165_v46 }
 0x2cb   :  { %v279_v47 = vpop.xlane.xlu0 %278 }
 0x2cc   :  { %v283_v48 = vsub.f32 %v271_v34, %v279_v47 }
 0x2cd   :  { %v282_v49 = vpop.xlane.xlu1 %281 }
 0x2ce   :  { %v285_v50 = vmul.f32 1.442695, %v283_v48  ;;  %v284_v51 = vsub.f32 %v274_v37, %v282_v49 }
 0x2d0   :  { %1226 = vpow2.f32 %v285_v50  ;;  %v287_v52 = vmul.f32 1.442695, %v284_v51 }
 0x2d2   :  { %v1223_v53 = vpop.eup %1222  ;;  %1228 = vpow2.f32 %v287_v52 }
 0x2d3   :  { %v167_v54 = vsel %vm154_vm3, %v1223_v53, 0.0 }
 0x2d4   :  { %v1225_v55 = vpop.eup %1224  ;;  %168 = vadd.xlane.f32.xlu0 %v167_v54 }
 0x2d5   :  { %v170_v56 = vsel %vm154_vm3, %v1225_v55, 0.0 }
 0x2d6   :  { %171 = vadd.xlane.f32.xlu1 %v170_v56 }
 0x2da   :  { %v1227_v57 = vpop.eup %1226 }
 0x2db   :  { %v289_v58 = vsel %vm154_vm3, %v1227_v57, 0.0 }
 0x2dc   :  { %v1229_v59 = vpop.eup %1228  ;;  %290 = vadd.xlane.f32.xlu0 %v289_v58 }
 0x2dd   :  { %v292_v60 = vsel %vm154_vm3, %v1229_v59, 0.0 }
 0x2de   :  { %293 = vadd.xlane.f32.xlu1 %v292_v60 }
 0x2ef   :  { %300 = vrot.lane.b32.xlu1 %v1357_v17, %s1271_s1 }
 0x2f2   :  { %178 = vrot.lane.b32.xlu0 %v1357_v17, %s1272_s15 }
 0x2f3   :  { %445 = vrot.lane.b32.xlu1 %v1357_v17, %s1273_s16 }
 0x2f6   :  { %443 = vrot.lane.b32.xlu0 %v1357_v17, %s1274_s17 }
 0x361   :  { %v169_v61 = vpop.xlane.xlu0 %168 }
 0x362   :  { %1230 = vrcp.f32 %v169_v61 }
 0x363   :  { %v172_v62 = vpop.xlane.xlu1 %171 }
 0x364   :  { %1232 = vrcp.f32 %v172_v62 }
 0x369   :  { %v291_v63 = vpop.xlane.xlu0 %290 }
 0x36a   :  { %1234 = vrcp.f32 %v291_v63 }
 0x36b   :  { %v294_v1 = vpop.xlane.xlu1 %293 }
 0x36c   :  { %v1231_v2 = vpop.eup %1230  ;;  %1236 = vrcp.f32 %v294_v1 }
 0x36d   :  { %v179_v5 = vpop.permute.xlu0 %178  ;;  %v175_v8 = vmul.f32 %v1231_v2, %v1223_v53 }
 0x36e   :  { %v1233_v6 = vpop.eup %1232  ;;  %1116 = vmatpush3.bf16.msra.mxu0 %v179_v5 }
 0x36f   :  { %1127 = vmatprep.subr.bf16.mxu0 %v1266_v0  ;;  %v176_v10 = vmul.f32 %v1233_v6, %v1225_v55  ;;  %v301_v12 = vpop.permute.xlu1 %300 }
 0x371   :  { %v177_v11 = vpack.c.bf16 %v176_v10, %v175_v8  ;;  %v444_v37 = vpop.permute.xlu0 %443 }
 0x373   :  { %1118 = vmatmul.mubr.msk.bf16.vlgmr.msra.gmra.mrb[0].mxu0 %vm154_vm3, %v177_v11  ;;  %v446_v32 = vpop.permute.xlu1 %445 }
 0x374   :  { %v1235_v13 = vpop.eup %1234  ;;  %1128 = vmatpush3.bf16.msra.mxu0 %v301_v12  ;;  %1129 = vmatprep.mubr.msk.bf16.mxu0 %vm1267_vm0, %v1266_v0  ;;  %v451_v36 = vsel %vm106_vm2, %v446_v32, 0 }
 0x375   :  { %1139 = vmatprep.subr.bf16.mxu0 %v1266_v0  ;;  %v297_v15 = vmul.f32 %v1235_v13, %v1227_v57 }
 0x376   :  { %v1237_v14 = vpop.eup %1236 }
 0x377   :  { %v298_v16 = vmul.f32 %v1237_v14, %v1229_v59 }
 0x379   :  { %v299_v18 = vpack.c.bf16 %v298_v16, %v297_v15 }
 0x37b   :  { %1130 = vmatmul.mubr.msk.bf16.vlgmr.msra.gmra.mrb[4].mxu0 %vm154_vm3, %v299_v18 }
 0x37c   :  { %1141 = vmatprep.mubr.msk.bf16.mxu0 %vm1267_vm0, %v1266_v0  ;;  %1140 = vmatpush3.bf16.msra.mxu0 %v400_v20  ;;  %v569_v20 = vsel %vm351_vm4, %v101_v19, 0 }
 0x37d   :  { %1151 = vmatprep.subr.bf16.mxu0 %v1266_v0 }
 0x446   :  { %v218_v24 = vpop.f32.mrb[0].mxu0 }
 0x447   :  { %v1119_v26 = vpop.f32.mrb[1].mxu0 }
 0x448   :  { %v221_v27 = vpop.f32.mrb[2].mxu0 }
 0x449   :  { %v225_v28 = vpack.c.bf16 %v221_v27, %v218_v24  ;;  %v1120_v29 = vpop.f32.mrb[3].mxu0 }
 0x44b   :  { %1142 = vmatmul.mubr.msk.bf16.vlgmr.msra.gmra.mrb[8].mxu0 %vm106_vm2, %v225_v28 }
 0x44c   :  { %1153 = vmatprep.mubr.msk.bf16.mxu0 %vm1267_vm0, %v1266_v0 }
 0x44e   :  { %v340_v30 = vpop.f32.mrb[4].mxu0 }
 0x44f   :  { %v1131_v31 = vpop.f32.mrb[5].mxu0 }
 0x450   :  { %v343_v33 = vpop.f32.mrb[6].mxu0 }
 0x451   :  { %v347_v34 = vpack.c.bf16 %v343_v33, %v340_v30  ;;  %v1132_v35 = vpop.f32.mrb[7].mxu0 }
 0x453   :  { %1136 = vmatmul.mubr.msk.bf16.vlgmr.msra.gmra.mrb[12].mxu1 %vm106_vm2, %v347_v34 }
 0x454   :  { %1146 = vmatpush3.bf16.xpose.msra.mxu1 %v451_v36  ;;  %1147 = vmatprep.mubr.msk.bf16.mxu1 %vm1267_vm0, %v1266_v0 }
 0x455   :  { %1157 = vmatprep.subr.bf16.mxu1 %v1266_v0 }
 0x45b   :  { %1148 = vmatmul.mubr.msk.bf16.vlgmr.msra.gmra.mrb[16].mxu1 %vm106_vm2, %v444_v37 }
 0x45c   :  { %1159 = vmatprep.mubr.msk.bf16.mxu1 %vm1267_vm0, %v1266_v0  ;;  %1158 = vmatpush3.bf16.msra.mxu1 %v569_v20 }
 0x45d   :  { %1169 = vmatprep.subr.bf16.mxu1 %v1266_v0 }
 0x51e   :  { %v436_v38 = vpop.f32.mrb[8].mxu0 }
 0x51f   :  { %v1143_v39 = vpop.f32.mrb[9].mxu0 }
 0x520   :  { %v439_v40 = vpop.f32.mrb[10].mxu0 }
 0x521   :  { %v1144_v41 = vpop.f32.mrb[11].mxu0 }
 0x526   :  { %v389_v42 = vpop.f32.mrb[12].mxu1 }
 0x527   :  { %v1428_v43 = vadd.f32 %v436_v38, %v389_v42  ;;  %v1137_v44 = vpop.f32.mrb[13].mxu1 }
 0x528   :  { %v392_v45 = vpop.f32.mrb[14].mxu1 }
 0x529   :  { %v1430_v46 = vadd.f32 %v439_v40, %v392_v45  ;;  %v1138_v47 = vpop.f32.mrb[15].mxu1 }
 0x52e   :  { %v487_v48 = vpop.f32.mrb[16].mxu1 }
 0x52f   :  { %v488_v49 = vadd.f32 %v487_v48, %v1376_v23  ;;  %v1149_v50 = vpop.f32.mrb[17].mxu1 }
 0x530   :  { %v490_v51 = vpop.f32.mrb[18].mxu1 }
 0x531   :  { %v491_v52 = vadd.f32 %v490_v51, %v1381_v25  ;;  %v1150_v53 = vpop.f32.mrb[19].mxu1  ;;  %v494_v54 = vsel %vm154_vm3, %v488_v49, -inf }
 0x532   :  { %495 = vmax.xlane.f32.xlu1 %v494_v54 }
 0x533   :  { %v497_v55 = vsel %vm154_vm3, %v491_v52, -inf }
 0x534   :  { %498 = vmax.xlane.f32.xlu0 %v497_v55 }
 0x5bf   :  { %v496_v56 = vpop.xlane.xlu1 %495 }
 0x5c0   :  { %v500_v57 = vsub.f32 %v488_v49, %v496_v56 }
 0x5c1   :  { %v499_v58 = vpop.xlane.xlu0 %498 }
 0x5c2   :  { %v502_v59 = vmul.f32 1.442695, %v500_v57  ;;  %v501_v60 = vsub.f32 %v491_v52, %v499_v58 }
 0x5c4   :  { %1238 = vpow2.f32 %v502_v59  ;;  %v504_v61 = vmul.f32 1.442695, %v501_v60 }
 0x5c6   :  { %1240 = vpow2.f32 %v504_v61 }
 0x5ce   :  { %v1239_v62 = vpop.eup %1238 }
 0x5cf   :  { %v506_v63 = vsel %vm154_vm3, %v1239_v62, 0.0 }
 0x5d0   :  { %v1241_v1 = vpop.eup %1240  ;;  %507 = vadd.xlane.f32.xlu0 %v506_v63 }
 0x5d1   :  { %v509_v2 = vsel %vm154_vm3, %v1241_v1, 0.0 }
 0x5d2   :  { %510 = vadd.xlane.f32.xlu1 %v509_v2 }
 0x5e3   :  { %616 = vrot.lane.b32.xlu1 %v1357_v17, %s1275_s22 }
 0x5e6   :  { %517 = vrot.lane.b32.xlu0 %v1357_v17, %s1276_s23 }
 0x5e7   :  { %614 = vrot.lane.b32.xlu1 %v1357_v17, %s1277_s24 }
 0x65d   :  { %v508_v5 = vpop.xlane.xlu0 %507 }
 0x65e   :  { %1242 = vrcp.f32 %v508_v5 }
 0x65f   :  { %v511_v6 = vpop.xlane.xlu1 %510 }
 0x660   :  { %1244 = vrcp.f32 %v511_v6 }
 0x661   :  { %v518_v8 = vpop.permute.xlu0 %517 }
 0x662   :  { %1152 = vmatpush3.bf16.msra.mxu0 %v518_v8 }
 0x663   :  { %1163 = vmatprep.subr.bf16.mxu0 %v1266_v0  ;;  %v617_v14 = vpop.permute.xlu1 %616 }
 0x664   :  { %v622_v16 = vsel %vm106_vm2, %v617_v14, 0 }
 0x667   :  { %v615_v18 = vpop.permute.xlu1 %614 }
 0x668   :  { %v1243_v10 = vpop.eup %1242 }
 0x669   :  { %v514_v12 = vmul.f32 %v1243_v10, %v1239_v62 }
 0x66a   :  { %v1245_v11 = vpop.eup %1244 }
 0x66b   :  { %v515_v13 = vmul.f32 %v1245_v11, %v1241_v1  ;;  %v787_v1 = vsub.s32 1, %v1348_v7 }
 0x66d   :  { %v516_v15 = vpack.c.bf16 %v515_v13, %v514_v12  ;;  %v788_v2 = vrot.slane %v1354_v9, %v787_v1 }
 0x66f   :  { %1154 = vmatmul.mubr.msk.bf16.vlgmr.msra.gmra.mrb[12].mxu0 %vm154_vm3, %v516_v15 }
 0x670   :  { %1164 = vmatpush3.bf16.xpose.msra.mxu0 %v622_v16  ;;  %1165 = vmatprep.mubr.msk.bf16.mxu0 %vm1267_vm0, %v1266_v0 }
 0x671   :  { %1175 = vmatprep.subr.bf16.mxu0 %v1266_v0 }
 0x677   :  { %1166 = vmatmul.mubr.msk.bf16.vlgmr.msra.gmra.mrb[16].mxu0 %vm106_vm2, %v615_v18 }
 0x678   :  { %1177 = vmatprep.mubr.msk.bf16.mxu0 %vm1267_vm0, %v1266_v0 }
 0x742   :  { %v557_v21 = vpop.f32.mrb[12].mxu0 }
 0x743   :  { %v1155_v22 = vpop.f32.mrb[13].mxu0 }
 0x744   :  { %v560_v24 = vpop.f32.mrb[14].mxu0 }
 0x745   :  { %v564_v26 = vpack.c.bf16 %v560_v24, %v557_v21  ;;  %v1156_v27 = vpop.f32.mrb[15].mxu0 }
 0x747   :  { %1160 = vmatmul.mubr.msk.bf16.vlgmr.msra.gmra.mrb[20].mxu1 %vm106_vm2, %v564_v26 }
 0x748   :  { %1171 = vmatprep.mubr.msk.bf16.mxu1 %vm1267_vm0, %v1266_v0 }
 0x74a   :  { %v658_v28 = vpop.f32.mrb[16].mxu0 }
 0x74b   :  { %v659_v29 = vadd.f32 %v658_v28, %v1376_v23  ;;  %v1167_v30 = vpop.f32.mrb[17].mxu0 }
 0x74c   :  { %v661_v31 = vpop.f32.mrb[18].mxu0 }
 0x74d   :  { %v662_v32 = vadd.f32 %v661_v31, %v1381_v25  ;;  %v1168_v33 = vpop.f32.mrb[19].mxu0  ;;  %v665_v34 = vsel %vm154_vm3, %v659_v29, -inf  ;;  %v1217_v31 = vld [vmem:[%s1539_s4 + $0x8] sm:$0xff]  }
 0x74e   :  { %666 = vmax.xlane.f32.xlu0 %v665_v34 }
 0x74f   :  { %v668_v35 = vsel %vm154_vm3, %v662_v32, -inf }
 0x750   :  { %669 = vmax.xlane.f32.xlu1 %v668_v35 }
 0x761   :  { %688 = vrot.lane.b32.xlu1 %v1357_v17, %s1278_s27  ;;  %v102_v17 = vld [vmem:[%s1538_s3 + $0xc] sm:$0xf] }
 0x762   :  { %v740_v47 = vsel %vm351_vm4, %v102_v17, 0 }
 0x763   :  { %1176 = vmatpush3.bf16.msra.mxu0 %v740_v47 }
 0x764   :  { %1189 = vmatprep.subr.bf16.mxu0 %v1266_v0 }
 0x7db   :  { %v667_v36 = vpop.xlane.xlu0 %666 }
 0x7dc   :  { %v671_v37 = vsub.f32 %v659_v29, %v667_v36 }
 0x7dd   :  { %v670_v38 = vpop.xlane.xlu1 %669 }
 0x7de   :  { %v673_v39 = vmul.f32 1.442695, %v671_v37  ;;  %v672_v40 = vsub.f32 %v662_v32, %v670_v38  ;;  %v822_v38 = vsub.s32 2, %v1348_v7 }
 0x7e0   :  { %1246 = vpow2.f32 %v673_v39  ;;  %v675_v23 = vmul.f32 1.442695, %v672_v40  ;;  %v823_v40 = vrot.slane %v1354_v9, %v822_v38 }
 0x7e1   :  { %v689_v41 = vpop.permute.xlu1 %688 }
 0x7e2   :  { %1248 = vpow2.f32 %v675_v23  ;;  %1170 = vmatpush3.bf16.msra.mxu1 %v689_v41  ;;  %v828_v41 = vsub.s32 3, %v1348_v7 }
 0x7e3   :  { %1181 = vmatprep.subr.bf16.mxu1 %v1266_v0 }
 0x7ea   :  { %v1247_v25 = vpop.eup %1246 }
 0x7eb   :  { %v677_v42 = vsel %vm154_vm3, %v1247_v25, 0.0 }
 0x7ec   :  { %v1249_v44 = vpop.eup %1248  ;;  %678 = vadd.xlane.f32.xlu0 %v677_v42 }
 0x7ed   :  { %v680_v45 = vsel %vm154_vm3, %v1249_v44, 0.0 }
 0x7f0   :  { %681 = vadd.xlane.f32.xlu0 %v680_v45  ;;  %v829_v45 = vrot.slane %v1354_v9, %v828_v41 }
 0x81a   :  { %v605_v48 = vpop.f32.mrb[20].mxu1 }
 0x81b   :  { %v612_v49 = vadd.f32 %v605_v48, %v1428_v43  ;;  %v1161_v50 = vpop.f32.mrb[21].mxu1 }
 0x81c   :  { %v608_v51 = vpop.f32.mrb[22].mxu1  ;;  %v1218_v50 = vld [vmem:[%s1540_s5] sm:$0xff]  }
 0x81d   :  { %v613_v52 = vadd.f32 %v608_v51, %v1430_v46  ;;  %v1162_v53 = vpop.f32.mrb[23].mxu1  ;;  %v1219_v51 = vld [vmem:[%s1540_s5 + $0x8] sm:$0xff]  }
 0x81e   :  { %v1221_v53 = vld [vmem:[%s1540_s5 + $0x18] sm:$0xff]  }
 0x879   :  { %v679_v54 = vpop.xlane.xlu0 %678 }
 0x87a   :  { %1250 = vrcp.f32 %v679_v54  ;;  %v839_v54 = vsub.s32 4, %v1348_v7 }
 0x87d   :  { %v682_v55 = vpop.xlane.xlu0 %681 }
 0x87e   :  { %1252 = vrcp.f32 %v682_v55  ;;  %v840_v55 = vrot.slane %v1354_v9, %v839_v54 }
 0x884   :  { %v1251_v56 = vpop.eup %1250 }
 0x885   :  { %v685_v58 = vmul.f32 %v1251_v56, %v1247_v25 }
 0x888   :  { %v1253_v57 = vpop.eup %1252 }
 0x889   :  { %v686_v59 = vmul.f32 %v1253_v57, %v1249_v44 }
 0x88b   :  { %v687_v60 = vpack.c.bf16 %v686_v59, %v685_v58 }
 0x88d   :  { %1172 = vmatmul.mubr.msk.bf16.vlgmr.msra.gmra.mrb[24].mxu1 %vm154_vm3, %v687_v60 }
 0x88e   :  { %1185 = vmatprep.mubr.msk.bf16.mxu1 %vm1267_vm0, %v1266_v0 }
 0x960   :  { %v728_v43 = vpop.f32.mrb[24].mxu1 }
 0x961   :  { %v1173_v61 = vpop.f32.mrb[25].mxu1 }
 0x962   :  { %v731_v62 = vpop.f32.mrb[26].mxu1 }
 0x963   :  { %v735_v63 = vpack.c.bf16 %v731_v62, %v728_v43  ;;  %v1174_v46 = vpop.f32.mrb[27].mxu1 }
 0x965   :  { %1178 = vmatmul.mubr.msk.bf16.vlgmr.msra.gmra.mrb[20].mxu0 %vm106_vm2, %v735_v63 }
 0x966   :  { %1197 = vmatprep.mubr.msk.bf16.mxu0 %vm1267_vm0, %v1266_v0  ;;  %1190 = vmatpush3.bf16.msra.mxu0 %v1218_v50 }
 0x967   :  { %1191 = vmatprep.subr.bf16.mxu0 %v1266_v0 }
 0x96a   :  { %1192 = vmatpush3.bf16.msra.mxu0 %v1219_v51 }
 0x96b   :  { %1193 = vmatprep.subr.bf16.mxu0 %v1266_v0 }
 0xa38   :  { %v776_v5 = vpop.f32.mrb[20].mxu0 }
 0xa39   :  { %v783_v6 = vadd.f32 %v776_v5, %v612_v49  ;;  %v1179_v8 = vpop.f32.mrb[21].mxu0 }
 0xa3a   :  { %v779_v10 = vpop.f32.mrb[22].mxu0 }
 0xa3b   :  { %v789_v11 = vadd.f32 %v788_v2, %v783_v6  ;;  %v784_v12 = vadd.f32 %v779_v10, %v613_v52  ;;  %v1180_v13 = vpop.f32.mrb[23].mxu0  ;;  %v1220_v52 = vld [vmem:[%s1540_s5 + $0x10] sm:$0xff]  }
 0xa3c   :  { %1194 = vmatpush3.bf16.msra.mxu0 %v1220_v52 }
 0xa3d   :  { %v790_v14 = vadd.f32 %v788_v2, %v784_v12  ;;  %v791_v15 = vadd.f32 %v789_v11, %v1334_v3  ;;  %1195 = vmatprep.subr.bf16.mxu0 %v1266_v0 }
 0xa3f   :  { %v793_v16 = vsel %vm53_vm1, %v791_v15, 0.0  ;;  %v792_v18 = vadd.f32 %v790_v14, %v1339_v4  ;;  %v1216_v4 = vld [vmem:[%s1539_s4] sm:$0xff]  }
 0xa40   :  { %794 = vadd.xlane.f32.xlu0 %v793_v16  ;;  %1182 = vmatpush3.bf16.msra.mxu1 %v1216_v4 }
 0xa41   :  { %v796_v19 = vsel %vm53_vm1, %v792_v18, 0.0  ;;  %1183 = vmatprep.subr.bf16.mxu1 %v1266_v0  ;;  %1196 = vmatpush3.bf16.msra.mxu0 %v1221_v53 }
 0xa44   :  { %797 = vadd.xlane.f32.xlu0 %v796_v19  ;;  %1184 = vmatpush3.bf16.msra.mxu1 %v1217_v31 }
 0xacd   :  { %v795_v20 = vpop.xlane.xlu0 %794 }
 0xace   :  { %v800_v21 = vmul.f32 0.03125, %v795_v20  ;;  %v926_v20 = vsub.s32 5, %v1348_v7 }
 0xad0   :  { %v802_v22 = vsub.f32 %v791_v15, %v800_v21  ;;  %v927_v21 = vrot.slane %v1354_v9, %v926_v20 }
 0xad1   :  { %v798_v24 = vpop.xlane.xlu0 %797 }
 0xad2   :  { %v801_v26 = vmul.f32 0.03125, %v798_v24  ;;  %v804_v27 = vmul.f32 %v802_v22, %v802_v22 }
 0xad4   :  { %v803_v28 = vsub.f32 %v792_v18, %v801_v26  ;;  %v806_v29 = vsel %vm53_vm1, %v804_v27, 0.0 }
 0xad5   :  { %807 = vadd.xlane.f32.xlu0 %v806_v29 }
 0xad6   :  { %v805_v30 = vmul.f32 %v803_v28, %v803_v28 }
 0xad8   :  { %v809_v3 = vsel %vm53_vm1, %v805_v30, 0.0 }
 0xad9   :  { %810 = vadd.xlane.f32.xlu0 %v809_v3 }
 0xb62   :  { %v808_v32 = vpop.xlane.xlu0 %807 }
 0xb63   :  { %v812_v33 = vmul.f32 0.03125, %v808_v32 }
 0xb65   :  { %v814_v34 = vadd.f32 1e-05, %v812_v33 }
 0xb66   :  { %v811_v35 = vpop.xlane.xlu0 %810 }
 0xb67   :  { %1254 = vrsqrt.f32 %v814_v34  ;;  %v813_v36 = vmul.f32 0.03125, %v811_v35 }
 0xb69   :  { %v815_v37 = vadd.f32 1e-05, %v813_v36 }
 0xb6b   :  { %1256 = vrsqrt.f32 %v815_v37 }
 0xb71   :  { %v1255_v39 = vpop.eup %1254 }
 0xb72   :  { %v818_v23 = vmul.f32 %v1255_v39, %v802_v22 }
 0xb74   :  { %v824_v42 = vmul.f32 %v823_v40, %v818_v23 }
 0xb75   :  { %v1257_v25 = vpop.eup %1256 }
 0xb76   :  { %v819_v44 = vmul.f32 %v1257_v25, %v803_v28  ;;  %v830_v47 = vadd.f32 %v829_v45, %v824_v42 }
 0xb78   :  { %v825_v17 = vmul.f32 %v823_v40, %v819_v44 }
 0xb7a   :  { %v831_v48 = vadd.f32 %v829_v45, %v825_v17 }
 0xb7c   :  { %v832_v49 = vpack.c.bf16 %v831_v48, %v830_v47 }
 0xb7e   :  { %1186 = vmatmul.mubr.msk.bf16.vlgmr.msra.gmra.mrb[28].mxu1 %vm53_vm1, %v832_v49 }
 0xc51   :  { %v890_v56 = vpop.f32.mrb[28].mxu1 }
 0xc52   :  { %v891_v57 = vadd.f32 %v890_v56, %v840_v55  ;;  %v1187_v58 = vpop.f32.mrb[29].mxu1 }
 0xc53   :  { %v893_v59 = vpop.f32.mrb[30].mxu1 }
 0xc54   :  { %v897_v60 = vmul.f32 %v891_v57, %v891_v57  ;;  %v894_v43 = vadd.f32 %v893_v59, %v840_v55  ;;  %v1188_v61 = vpop.f32.mrb[31].mxu1 }
 0xc56   :  { %v899_v62 = vmul.f32 %v897_v60, %v891_v57  ;;  %v898_v63 = vmul.f32 %v894_v43, %v894_v43 }
 0xc58   :  { %v901_v46 = vmul.f32 0.044715, %v899_v62  ;;  %v900_v0 = vmul.f32 %v898_v63, %v894_v43 }
 0xc5a   :  { %v903_v1 = vadd.f32 %v901_v46, %v891_v57  ;;  %v902_v2 = vmul.f32 0.044715, %v900_v0 }
 0xc5c   :  { %v905_v5 = vmul.f32 0.7978846, %v903_v1  ;;  %v904_v6 = vadd.f32 %v902_v2, %v894_v43 }
 0xc5e   :  { %1258 = vtanh.f32 %v905_v5  ;;  %v906_v8 = vmul.f32 0.7978846, %v904_v6 }
 0xc60   :  { %1260 = vtanh.f32 %v906_v8 }
 0xc68   :  { %v1259_v10 = vpop.eup %1258 }
 0xc69   :  { %v909_v11 = vadd.f32 1.0, %v1259_v10 }
 0xc6a   :  { %v1261_v12 = vpop.eup %1260 }
 0xc6b   :  { %v911_v13 = vmul.f32 0.5, %v909_v11  ;;  %v910_v14 = vadd.f32 1.0, %v1261_v12 }
 0xc6d   :  { %v912_v15 = vmul.f32 0.5, %v910_v14  ;;  %v913_v16 = vmul.f32 %v911_v13, %v891_v57 }
 0xc6f   :  { %v914_v18 = vmul.f32 %v912_v15, %v894_v43 }
 0xc71   :  { %v915_v19 = vpack.c.bf16 %v914_v18, %v913_v16 }
 0xc73   :  { %1198 = vmatmul.mubr.msk.bf16.vlgmr.msra.gmra.mrb[24].mxu0 %vm952_vm5, %v915_v19 }
 0xd46   :  { %v990_v22 = vpop.f32.mrb[24].mxu0 }
 0xd47   :  { %v991_v24 = vadd.f32 %v990_v22, %v927_v21  ;;  %v1199_v26 = vpop.f32.mrb[25].mxu0 }
 0xd48   :  { %v993_v27 = vpop.f32.mrb[26].mxu0 }
 0xd49   :  { %v994_v28 = vadd.f32 %v993_v27, %v927_v21  ;;  %v1200_v29 = vpop.f32.mrb[27].mxu0  ;;  %v997_v30 = vadd.f32 %v991_v24, %v830_v47  ;;  %v1027_v47 = vsub.s32 6, %v1348_v7 }
 0xd4b   :  { %v999_v3 = vsel %vm53_vm1, %v997_v30, 0.0  ;;  %v998_v4 = vadd.f32 %v994_v28, %v831_v48  ;;  %v1033_v48 = vsub.s32 7, %v1348_v7  ;;  %v1028_v49 = vrot.slane %v1354_v9, %v1027_v47 }
 0xd4c   :  { %1000 = vadd.xlane.f32.xlu1 %v999_v3 }
 0xd4d   :  { %v1002_v31 = vsel %vm53_vm1, %v998_v4, 0.0  ;;  %v1034_v51 = vrot.slane %v1354_v9, %v1033_v48 }
 0xd4e   :  { %1003 = vadd.xlane.f32.xlu0 %v1002_v31 }
 0xdd9   :  { %v1001_v32 = vpop.xlane.xlu1 %1000 }
 0xdda   :  { %v1005_v33 = vmul.f32 0.03125, %v1001_v32 }
 0xddb   :  { %v1004_v34 = vpop.xlane.xlu0 %1003 }
 0xddc   :  { %v1007_v35 = vsub.f32 %v997_v30, %v1005_v33  ;;  %v1006_v36 = vmul.f32 0.03125, %v1004_v34 }
 0xdde   :  { %v1008_v37 = vsub.f32 %v998_v4, %v1006_v36  ;;  %v1009_v38 = vmul.f32 %v1007_v35, %v1007_v35 }
 0xde0   :  { %v1011_v39 = vsel %vm53_vm1, %v1009_v38, 0.0  ;;  %v1010_v40 = vmul.f32 %v1008_v37, %v1008_v37 }
 0xde1   :  { %1012 = vadd.xlane.f32.xlu0 %v1011_v39 }
 0xde2   :  { %v1014_v23 = vsel %vm53_vm1, %v1010_v40, 0.0 }
 0xde5   :  { %1015 = vadd.xlane.f32.xlu0 %v1014_v23 }
 0xe6e   :  { %v1013_v41 = vpop.xlane.xlu0 %1012 }
 0xe6f   :  { %v1017_v25 = vmul.f32 0.03125, %v1013_v41 }
 0xe71   :  { %v1019_v42 = vadd.f32 1e-05, %v1017_v25 }
 0xe72   :  { %v1016_v44 = vpop.xlane.xlu0 %1015 }
 0xe73   :  { %1262 = vrsqrt.f32 %v1019_v42  ;;  %v1018_v45 = vmul.f32 0.03125, %v1016_v44 }
 0xe75   :  { %v1020_v17 = vadd.f32 1e-05, %v1018_v45 }
 0xe77   :  { %1264 = vrsqrt.f32 %v1020_v17 }
 0xe7d   :  { %v1263_v50 = vpop.eup %1262 }
 0xe7e   :  { %v1023_v52 = vmul.f32 %v1263_v50, %v1007_v35 }
 0xe80   :  { %v1029_v53 = vmul.f32 %v1028_v49, %v1023_v52 }
 0xe81   :  { %v1265_v54 = vpop.eup %1264 }
 0xe82   :  { %v1035_v55 = vadd.f32 %v1034_v51, %v1029_v53  ;;  %v1024_v56 = vmul.f32 %v1265_v54, %v1008_v37 }
 0xe84   :  { %1037 = vst.msk [vmem:[%s1541_s7] sm:$0xff] %vm53_vm1, %v1035_v55  ;;  %v1030_v57 = vmul.f32 %v1028_v49, %v1024_v56 }
 0xe86   :  { %v1036_v58 = vadd.f32 %v1034_v51, %v1030_v57 }
 0xe88   :  { %1038 = vst.msk [vmem:[%s1541_s7 + $0x8] sm:$0xff] %vm53_vm1, %v1036_v58 }

</bundles_post_ra>
